<compile_context>
chip_gen: v7x
topology: tpu7x:2x2x1
jax: 0.10.0
libtpu: 0.0.40
codegen_flags: <defaults>
</compile_context>

<pallas_src>
import functools

import jax
import jax.numpy as jnp
from jax.experimental import pallas as pl
from jax.experimental.pallas import tpu as pltpu


def _dot_attention_kernel(q_ref, a_ref, w2_ref, bias_ref, out_ref, sc_ref, *,
                          fuse_proj):
    # q_ref  : (T, Bb, H)   time-major query block (module layout, no wrapper transpose)
    # a_ref  : (S, Bb, H)   time-major annotation block
    # w2_ref : (2H, H)      weight.T (rows 0..H-1 = query half, H..2H-1 = context half)
    # bias_ref: (1, H)      bias, f32
    # out_ref: (T, Bb*H)    lane-dense, time-major slab of attentional states
    # sc_ref : (T, Bb*S)    lane-dense, time-major slab of attention scores
    t, bb, h = q_ref.shape
    s_len = a_ref.shape[0]

    q_tm = q_ref[...]                       # (T, Bb, H), caller dtype
    a_tm = a_ref[...]                       # (S, Bb, H)

    q_rows = []                             # per-batch (T, H) query tiles
    ctx_rows = []                           # per-batch (T, H) context tiles
    # Static unroll over the batch block (Bb is capped by the wrapper): every
    # op below is a plain 2-D dot / reduce / slice, so nothing forces a VMEM
    # relayout of q or ctx, and MXU utilization is identical to the batched
    # einsum form (batch never merges into M for the score/context matmuls).
    for b in range(bb):
        qb = q_tm[:, b, :]                  # (T, H)
        ab = a_tm[:, b, :]                  # (S, H)

        # scores = softmax(q @ a^T): contraction on the trailing lane dim,
        # f32 accumulation on the MXU (inputs stay in the caller's dtype).
        sb = jnp.einsum("th,sh->ts", qb, ab,
                        preferred_element_type=jnp.float32)     # (T, S) f32
        sb = sb - jnp.max(sb, axis=-1, keepdims=True)
        eb = jnp.exp(sb)
        pb = eb / jnp.sum(eb, axis=-1, keepdims=True)           # exact divide

        # context = p @ a ; MXU in the caller's dtype, f32 accumulation.
        cb = jnp.einsum("ts,sh->th", pb.astype(ab.dtype), ab,
                        preferred_element_type=jnp.float32)     # (T, H) f32

        q_rows.append(qb)
        ctx_rows.append(cb.astype(qb.dtype))

        # Lane-dense slab store of the scores (time-major rows, batch in lanes).
        sc_ref[:, b * s_len:(b + 1) * s_len] = pb.astype(sc_ref.dtype)

    # attend: tanh(concat([Q, ctx]) @ W^T + bias), with (Bb, T) collapsed into
    # one MXU M dimension (M = Bb*T) for the projection.
    q_all = jnp.concatenate(q_rows, axis=0)                     # (Bb*T, H)
    c_all = jnp.concatenate(ctx_rows, axis=0)                   # (Bb*T, H)
    if fuse_proj:
        # H < 128: a single K=2H matmul fills the MXU K far better than two
        # K=H dots; the concat is a cheap lane placement.
        x_all = jnp.concatenate([q_all, c_all], axis=-1)        # (Bb*T, 2H)
        acc = jnp.dot(x_all, w2_ref[...], preferred_element_type=jnp.float32)
    else:
        # K already MXU-native; skip the lane concat (per review).
        acc = jnp.dot(q_all, w2_ref[:h, :], preferred_element_type=jnp.float32)
        acc = acc + jnp.dot(c_all, w2_ref[h:, :],
                            preferred_element_type=jnp.float32)
    out = jnp.tanh(acc + bias_ref[...].astype(jnp.float32))     # (Bb*T, H) f32

    # Lane-dense slab store of the states: the out_spec's last dim is Bb*H, so
    # the writeback is dense even for small H, and the wrapper only needs a
    # free reshape (no post-transpose) to recover (T, B, H).
    for b in range(bb):
        out_ref[:, b * h:(b + 1) * h] = (
            out[b * t:(b + 1) * t, :].astype(out_ref.dtype))


def _vmem_capacity_bytes():
    """Per-generation VMEM (v5e/v6e: 128 MiB, v7x: 64 MiB per TensorCore)."""
    try:
        cap = getattr(pltpu.get_tpu_info(), "vmem_capacity_bytes", None)
        if cap:
            return int(cap)
    except Exception:
        pass
    return 64 * 2**20          # conservative fallback = v7x


def _per_step_vmem_bytes(bb, t, s, h, in_itemsize, out_itemsize):
    """Rough per-grid-step VMEM footprint: double-buffered pipelined operands
    plus f32 intermediates (scores/probs/contexts/projection and copies)."""
    db = 2
    io = (db * bb * (t + s) * h * in_itemsize          # q / a input blocks
          + db * bb * t * (h + s) * out_itemsize)      # state / score slabs
    consts = db * (2 * h * h * in_itemsize + h * 4)    # weight + bias
    interm = 4 * bb * t * (4 * s + 6 * h)              # f32 s/e/p, ctx/x/acc/out
    return io + consts + interm


def _pick_block_b(batch, t, s, h, in_itemsize, out_itemsize, budget_bytes):
    """VMEM-budget-driven batch block, preferring an MXU-native projection M."""
    def tiling_ok(bb):
        if batch // bb == 1:
            return True                    # blocks equal the full array dims
        # bb is a sublane dim on the (T, bb, H) input blocks; bb*H / bb*S are
        # lane dims on the (T, bb*H)/(T, bb*S) output slabs -> (8,128) rules.
        return bb % 8 == 0 and (bb * h) % 128 == 0 and (bb * s) % 128 == 0

    # Cap the static in-kernel unroll (program size; M beyond a few MXU tiles
    # has diminishing returns anyway).
    legal = [bb for bb in range(1, min(batch, 64) + 1)
             if batch % bb == 0 and tiling_ok(bb)]
    if not legal:
        legal = [batch]
    fits = [bb for bb in legal
            if _per_step_vmem_bytes(bb, t, s, h, in_itemsize, out_itemsize)
            <= budget_bytes]
    pool = fits or [min(legal)]
    # Prefer Bb*T that fills the 256x256 (v6e/v7x) / 128x128 (v5e) MXU, then
    # the largest block (fewer ~0.35us serial grid steps).  NOTE: on v7x, >=2
    # "parallel" grid steps let both TensorCores work; we do not force that
    # here because on v5e/v6e grid steps are a serial loop and bigger wins.
    return max(pool, key=lambda bb: ((bb * t) % 256 == 0, (bb * t) % 128 == 0, bb))


@jax.jit
def dot_attention(queries, annotations, weight, bias):
    """DotAttention.forward (inference).

    queries:     (T, B, H) time-major (module contract)
    annotations: (S, B, H)
    weight:      (H, 2H)   nn.Linear(2H -> H) weight
    bias:        (H,)
    Returns: (attentional_states (T, B, H), scores (T, B, S)).
    """
    t, batch, h = queries.shape
    s = annotations.shape[0]
    out_dtype = queries.dtype
    in_itemsize = jnp.dtype(queries.dtype).itemsize
    out_itemsize = jnp.dtype(out_dtype).itemsize

    cap = _vmem_capacity_bytes()
    bb = _pick_block_b(batch, t, s, h, in_itemsize, out_itemsize,
                       budget_bytes=int(0.45 * cap))
    nb = batch // bb
    need = _per_step_vmem_bytes(bb, t, s, h, in_itemsize, out_itemsize)
    vmem_limit = int(min(0.9 * cap, max(32 * 2**20, 2 * need)))

    # Loop-invariant weight prep (once, outside the kernel):
    # concat([q, ctx]) @ W^T == [q | ctx] @ W.T  with W.T pre-materialized.
    w2 = weight.T                                   # (2H, H)
    b2d = bias.reshape(1, h).astype(jnp.float32)
    fuse_proj = h < 128

    flops = 4 * batch * t * s * h + 2 * (batch * t) * (2 * h) * h
    transcendentals = batch * t * (s + h)           # exp + tanh
    bytes_accessed = ((batch * t * h + batch * s * h + 2 * h * h + h)
                      * in_itemsize
                      + batch * t * (h + s) * out_itemsize)

    out_slab, sc_slab = pl.pallas_call(
        functools.partial(_dot_attention_kernel, fuse_proj=fuse_proj),
        out_shape=(
            jax.ShapeDtypeStruct((t, batch * h), out_dtype),
            jax.ShapeDtypeStruct((t, batch * s), out_dtype),
        ),
        grid_spec=pltpu.PrefetchScalarGridSpec(
            num_scalar_prefetch=0,
            grid=(nb,),
            in_specs=[
                pl.BlockSpec((t, bb, h), lambda i: (0, i, 0)),
                pl.BlockSpec((s, bb, h), lambda i: (0, i, 0)),
                # Grid-invariant operands.  NOTE: at production H these should
                # be single-buffered (pipeline_mode=pl.Buffered(1)) to save
                # VMEM; trivial at small H so default buffering is kept here.
                pl.BlockSpec((2 * h, h), lambda i: (0, 0)),
                pl.BlockSpec((1, h), lambda i: (0, 0)),
            ],
            out_specs=[
                pl.BlockSpec((t, bb * h), lambda i: (0, i)),
                pl.BlockSpec((t, bb * s), lambda i: (0, i)),
            ],
        ),
        compiler_params=pltpu.CompilerParams(
            dimension_semantics=("parallel",),
            vmem_limit_bytes=vmem_limit,
        ),
        cost_estimate=pl.CostEstimate(
            flops=flops,
            transcendentals=transcendentals,
            bytes_accessed=bytes_accessed,
        ),
    )(queries, annotations, w2, b2d)

    # Free reshapes: the slabs are already laid out time-major [T][B][H]/[T][B][S].
    return out_slab.reshape(t, batch, h), sc_slab.reshape(t, batch, s)


def _reference(queries, annotations, weight, bias):
    hp = jax.lax.Precision.HIGHEST
    q = jnp.transpose(queries, (1, 0, 2))
    a = jnp.transpose(annotations, (1, 0, 2))
    s = jnp.einsum("bth,bsh->bts", q, a, precision=hp)
    p = jax.nn.softmax(s, axis=-1)
    ctx = jnp.einsum("bts,bsh->bth", p, a, precision=hp)
    x = jnp.concatenate([q, ctx], axis=-1)
    h = jnp.tanh(jnp.einsum("bti,oi->bto", x, weight, precision=hp) + bias)
    return jnp.transpose(h, (1, 0, 2)), jnp.transpose(p, (1, 0, 2))


if __name__ == "__main__":
    hidden_dim = 32
    tgt_len, src_len, batch = 8, 8, 2

    key = jax.random.PRNGKey(0)
    kq, ka, kw = jax.random.split(key, 3)

    # Queries scaled by 1/sqrt(H) so softmax logits are O(1) (well-conditioned).
    queries = (jax.random.normal(kq, (tgt_len, batch, hidden_dim), jnp.float32)
               * hidden_dim ** -0.5)
    annotations = jax.random.normal(ka, (src_len, batch, hidden_dim), jnp.float32)

    # nn.Linear(2H -> H); kaiming_normal_ (fan_in = 2H, gain = sqrt(2)), bias = 0.
    fan_in = 2 * hidden_dim
    std = (2.0 / fan_in) ** 0.5
    weight = jax.random.normal(kw, (hidden_dim, 2 * hidden_dim), jnp.float32) * std
    bias = jnp.zeros((hidden_dim,), jnp.float32)

    states, scores = dot_attention(queries, annotations, weight, bias)
    jax.block_until_ready((states, scores))

    ref_states, ref_scores = _reference(queries, annotations, weight, bias)
    assert states.shape == (tgt_len, batch, hidden_dim)
    assert scores.shape == (tgt_len, batch, src_len)
    # Tolerance now only covers MXU f32 pass rounding in the matmuls; the
    # approximate softmax reciprocal (which previously forced 1e-2) is gone.
    assert jnp.allclose(states, ref_states, atol=5e-3, rtol=5e-3)
    assert jnp.allclose(scores, ref_scores, atol=5e-3, rtol=5e-3)
    assert bool(jnp.all(jnp.isfinite(states))) and bool(jnp.all(jnp.isfinite(scores)))

    print("KERNEL_OK")
</pallas_src>

<mosaic_0001>
module attributes {stable_mosaic.version = 11 : i64} {
  func.func @_dot_attention_kernel(%arg0: i32, %arg1: memref<8x2x32xf32, #tpu.memory_space<vmem>>, %arg2: memref<8x2x32xf32, #tpu.memory_space<vmem>>, %arg3: memref<64x32xf32, #tpu.memory_space<vmem>>, %arg4: memref<1x32xf32, #tpu.memory_space<vmem>>, %arg5: memref<8x64xf32, #tpu.memory_space<vmem>>, %arg6: memref<8x16xf32, #tpu.memory_space<vmem>>) attributes {dimension_semantics = [#tpu.dimension_semantics<parallel>], iteration_bounds = array<i64: 1>, scalar_prefetch = 0 : i64, scratch_operands = 0 : i64, tpu.core_type = #tpu.core_type<tc>, window_params = [{transform_indices = @transform_0, window_bounds = array<i64: 8, 2, 32>}, {transform_indices = @transform_1, window_bounds = array<i64: 8, 2, 32>}, {pipeline_mode = #tpu.pipeline_mode<synchronous>, transform_indices = @transform_2, window_bounds = array<i64: 64, 32>}, {pipeline_mode = #tpu.pipeline_mode<synchronous>, transform_indices = @transform_3, window_bounds = array<i64: 1, 32>}, {transform_indices = @transform_4, window_bounds = array<i64: 8, 64>}, {transform_indices = @transform_5, window_bounds = array<i64: 8, 16>}]} {
    %c0 = arith.constant 0 : index
    %c0_0 = arith.constant 0 : index
    %c0_1 = arith.constant 0 : index
    %0 = vector.load %arg1[%c0, %c0_0, %c0_1] : memref<8x2x32xf32, #tpu.memory_space<vmem>>, vector<8x2x32xf32>
    %c0_2 = arith.constant 0 : index
    %c0_3 = arith.constant 0 : index
    %c0_4 = arith.constant 0 : index
    %1 = vector.load %arg2[%c0_2, %c0_3, %c0_4] : memref<8x2x32xf32, #tpu.memory_space<vmem>>, vector<8x2x32xf32>
    %2 = vector.extract_strided_slice %0 {offsets = [0, 0, 0], sizes = [8, 1, 32], strides = [1, 1, 1]} : vector<8x2x32xf32> to vector<8x1x32xf32>
    %3 = vector.shape_cast %2 : vector<8x1x32xf32> to vector<8x32xf32>
    %4 = vector.extract_strided_slice %1 {offsets = [0, 0, 0], sizes = [8, 1, 32], strides = [1, 1, 1]} : vector<8x2x32xf32> to vector<8x1x32xf32>
    %5 = vector.shape_cast %4 : vector<8x1x32xf32> to vector<8x32xf32>
    "tpu.trace_start"() <{level = 10 : i32, message = "th,sh->ts"}> : () -> ()
    %cst = arith.constant dense<0.000000e+00> : vector<8x8xf32>
    %6 = tpu.matmul %3, %5, %cst {dimension_numbers = #tpu.dot_dimension_numbers<[1], [1], [0], [0], [0, 0, 1, 0], [], []>} : vector<8x32xf32>, vector<8x32xf32>, vector<8x8xf32> -> vector<8x8xf32>
    "tpu.trace_stop"() : () -> ()
    %cst_5 = arith.constant dense<0xFF800000> : vector<8xf32>
    %7 = vector.multi_reduction <maximumf>, %6, %cst_5 [1] : vector<8x8xf32> to vector<8xf32>
    %8 = vector.shape_cast %7 : vector<8xf32> to vector<8x1xf32>
    %9 = vector.broadcast %8 : vector<8x1xf32> to vector<8x8xf32>
    %10 = arith.subf %6, %9 : vector<8x8xf32>
    %11 = math.exp %10 : vector<8x8xf32>
    %cst_6 = arith.constant dense<0.000000e+00> : vector<8xf32>
    %12 = vector.multi_reduction <add>, %11, %cst_6 [1] : vector<8x8xf32> to vector<8xf32>
    %13 = vector.shape_cast %12 : vector<8xf32> to vector<8x1xf32>
    %14 = vector.broadcast %13 : vector<8x1xf32> to vector<8x8xf32>
    %15 = arith.divf %11, %14 : vector<8x8xf32>
    "tpu.trace_start"() <{level = 10 : i32, message = "ts,sh->th"}> : () -> ()
    %cst_7 = arith.constant dense<0.000000e+00> : vector<8x32xf32>
    %16 = tpu.matmul %15, %5, %cst_7 {dimension_numbers = #tpu.dot_dimension_numbers<[1], [0], [0], [1], [0, 0, 1, 1], [], []>} : vector<8x8xf32>, vector<8x32xf32>, vector<8x32xf32> -> vector<8x32xf32>
    "tpu.trace_stop"() : () -> ()
    %c0_8 = arith.constant 0 : index
    %c0_9 = arith.constant 0 : index
    %17 = vector.load %arg6[%c0_8, %c0_9] : memref<8x16xf32, #tpu.memory_space<vmem>>, vector<8x8xf32>
    tpu.vector_store %arg6[%c0_8, %c0_9], %15 {strides = array<i32>} : memref<8x16xf32, #tpu.memory_space<vmem>>, vector<8x8xf32>,
    %18 = vector.extract_strided_slice %0 {offsets = [0, 1, 0], sizes = [8, 1, 32], strides = [1, 1, 1]} : vector<8x2x32xf32> to vector<8x1x32xf32>
    %19 = vector.shape_cast %18 : vector<8x1x32xf32> to vector<8x32xf32>
    %20 = vector.extract_strided_slice %1 {offsets = [0, 1, 0], sizes = [8, 1, 32], strides = [1, 1, 1]} : vector<8x2x32xf32> to vector<8x1x32xf32>
    %21 = vector.shape_cast %20 : vector<8x1x32xf32> to vector<8x32xf32>
    "tpu.trace_start"() <{level = 10 : i32, message = "th,sh->ts"}> : () -> ()
    %cst_10 = arith.constant dense<0.000000e+00> : vector<8x8xf32>
    %22 = tpu.matmul %19, %21, %cst_10 {dimension_numbers = #tpu.dot_dimension_numbers<[1], [1], [0], [0], [0, 0, 1, 0], [], []>} : vector<8x32xf32>, vector<8x32xf32>, vector<8x8xf32> -> vector<8x8xf32>
    "tpu.trace_stop"() : () -> ()
    %cst_11 = arith.constant dense<0xFF800000> : vector<8xf32>
    %23 = vector.multi_reduction <maximumf>, %22, %cst_11 [1] : vector<8x8xf32> to vector<8xf32>
    %24 = vector.shape_cast %23 : vector<8xf32> to vector<8x1xf32>
    %25 = vector.broadcast %24 : vector<8x1xf32> to vector<8x8xf32>
    %26 = arith.subf %22, %25 : vector<8x8xf32>
    %27 = math.exp %26 : vector<8x8xf32>
    %cst_12 = arith.constant dense<0.000000e+00> : vector<8xf32>
    %28 = vector.multi_reduction <add>, %27, %cst_12 [1] : vector<8x8xf32> to vector<8xf32>
    %29 = vector.shape_cast %28 : vector<8xf32> to vector<8x1xf32>
    %30 = vector.broadcast %29 : vector<8x1xf32> to vector<8x8xf32>
    %31 = arith.divf %27, %30 : vector<8x8xf32>
    "tpu.trace_start"() <{level = 10 : i32, message = "ts,sh->th"}> : () -> ()
    %cst_13 = arith.constant dense<0.000000e+00> : vector<8x32xf32>
    %32 = tpu.matmul %31, %21, %cst_13 {dimension_numbers = #tpu.dot_dimension_numbers<[1], [0], [0], [1], [0, 0, 1, 1], [], []>} : vector<8x8xf32>, vector<8x32xf32>, vector<8x32xf32> -> vector<8x32xf32>
    "tpu.trace_stop"() : () -> ()
    %c0_14 = arith.constant 0 : index
    %c8 = arith.constant 8 : index
    %33 = vector.load %arg6[%c0_14, %c8] : memref<8x16xf32, #tpu.memory_space<vmem>>, vector<8x8xf32>
    tpu.vector_store %arg6[%c0_14, %c8], %31 {strides = array<i32>} : memref<8x16xf32, #tpu.memory_space<vmem>>, vector<8x8xf32>,
    %34 = tpu.concatenate %3, %19 in 0 : vector<8x32xf32>, vector<8x32xf32> -> vector<16x32xf32>
    %35 = tpu.concatenate %16, %32 in 0 : vector<8x32xf32>, vector<8x32xf32> -> vector<16x32xf32>
    %36 = tpu.concatenate %34, %35 in 1 : vector<16x32xf32>, vector<16x32xf32> -> vector<16x64xf32>
    %c0_15 = arith.constant 0 : index
    %c0_16 = arith.constant 0 : index
    %37 = vector.load %arg3[%c0_15, %c0_16] : memref<64x32xf32, #tpu.memory_space<vmem>>, vector<64x32xf32>
    %cst_17 = arith.constant dense<0.000000e+00> : vector<16x32xf32>
    %38 = tpu.matmul %36, %37, %cst_17 {dimension_numbers = #tpu.dot_dimension_numbers<[1], [0], [0], [1], [0, 0, 1, 1], [], []>} : vector<16x64xf32>, vector<64x32xf32>, vector<16x32xf32> -> vector<16x32xf32>
    %c0_18 = arith.constant 0 : index
    %c0_19 = arith.constant 0 : index
    %39 = vector.load %arg4[%c0_18, %c0_19] : memref<1x32xf32, #tpu.memory_space<vmem>>, vector<1x32xf32>
    %40 = vector.broadcast %39 : vector<1x32xf32> to vector<16x32xf32>
    %41 = arith.addf %38, %40 : vector<16x32xf32>
    %42 = math.tanh %41 : vector<16x32xf32>
    %43 = vector.extract_strided_slice %42 {offsets = [0, 0], sizes = [8, 32], strides = [1, 1]} : vector<16x32xf32> to vector<8x32xf32>
    %c0_20 = arith.constant 0 : index
    %c0_21 = arith.constant 0 : index
    %44 = vector.load %arg5[%c0_20, %c0_21] : memref<8x64xf32, #tpu.memory_space<vmem>>, vector<8x32xf32>
    tpu.vector_store %arg5[%c0_20, %c0_21], %43 {strides = array<i32>} : memref<8x64xf32, #tpu.memory_space<vmem>>, vector<8x32xf32>,
    %45 = vector.extract_strided_slice %42 {offsets = [8, 0], sizes = [8, 32], strides = [1, 1]} : vector<16x32xf32> to vector<8x32xf32>
    %c0_22 = arith.constant 0 : index
    %c32 = arith.constant 32 : index
    %46 = vector.load %arg5[%c0_22, %c32] : memref<8x64xf32, #tpu.memory_space<vmem>>, vector<8x32xf32>
    tpu.vector_store %arg5[%c0_22, %c32], %45 {strides = array<i32>} : memref<8x64xf32, #tpu.memory_space<vmem>>, vector<8x32xf32>,
    return
  }
  func.func @transform_0(%arg0: i32) -> (i32, i32, i32) {
    %c0_i32 = arith.constant 0 : i32
    %c0_i32_0 = arith.constant 0 : i32
    %c0_i32_1 = arith.constant 0 : i32
    return %c0_i32, %arg0, %c0_i32_0 : i32, i32, i32
  }
  func.func @transform_1(%arg0: i32) -> (i32, i32, i32) {
    %c0_i32 = arith.constant 0 : i32
    %c0_i32_0 = arith.constant 0 : i32
    %c0_i32_1 = arith.constant 0 : i32
    return %c0_i32, %arg0, %c0_i32_0 : i32, i32, i32
  }
  func.func @transform_2(%arg0: i32) -> (i32, i32) {
    %c0_i32 = arith.constant 0 : i32
    %c0_i32_0 = arith.constant 0 : i32
    %c0_i32_1 = arith.constant 0 : i32
    return %c0_i32, %c0_i32_0 : i32, i32
  }
  func.func @transform_3(%arg0: i32) -> (i32, i32) {
    %c0_i32 = arith.constant 0 : i32
    %c0_i32_0 = arith.constant 0 : i32
    %c0_i32_1 = arith.constant 0 : i32
    return %c0_i32, %c0_i32_0 : i32, i32
  }
  func.func @transform_4(%arg0: i32) -> (i32, i32) {
    %c0_i32 = arith.constant 0 : i32
    %c0_i32_0 = arith.constant 0 : i32
    return %c0_i32, %arg0 : i32, i32
  }
  func.func @transform_5(%arg0: i32) -> (i32, i32) {
    %c0_i32 = arith.constant 0 : i32
    %c0_i32_0 = arith.constant 0 : i32
    return %c0_i32, %arg0 : i32, i32
  }
}

</mosaic_0001>

<bundles_post_ra>
// kernel: dot_attention.1
= control target key start
LH: loop header
LB: loop body
LE: loop exit
PB: predicated region body
PF: predicated region fallthrough
CT: control target
= control target key end

     0   :  { %v664_v0 = vmov 0.0   ;;  %vm44_vm0 = vcmask 1041409   ;;  %vm47_vm1 = vcmask 1042434   ;;  %vm50_vm2 = vcmask 1043459   ;;  %s666_s25 = smov 32   ;;  %s667_s16 = smov 8   ;;  %s912_s1 = inlined_call_operand.vmem [shape: f32[8,2,32], index: 1, kind: input, shape index: {}]   ;;  %s913_s0 = inlined_call_operand.vmem [shape: f32[8,2,32], index: 0, kind: input, shape index: {}]   ;;  %s914_s5 = inlined_call_operand.vmem [shape: f32[8,16], index: 5, kind: output, shape index: {1}]   ;;  %s915_s2 = inlined_call_operand.vmem [shape: f32[64,32], index: 2, kind: input, shape index: {}]   ;;  %s916_s3 = inlined_call_operand.vmem [shape: f32[1,32], index: 3, kind: input, shape index: {}]   ;;  %s917_s4 = inlined_call_operand.vmem [shape: f32[8,64], index: 4, kind: output, shape index: {0}]  }
   0x1   :  { %593 = vmatprep.subr.mxu0 %v664_v0  ;;  %v702_v1 = vld [vmem:[%s912_s1 + $0x2] sm:$0x3]  ;;  %v707_v2 = vld [vmem:[%s912_s1 + $0x4] sm:$0x3]  ;;  %v712_v3 = vld [vmem:[%s912_s1 + $0x6] sm:$0x3] }
   0x2   :  { %v717_v4 = vld [vmem:[%s912_s1 + $0x8] sm:$0x3]  ;;  %v722_v5 = vld [vmem:[%s912_s1] sm:$0x3]  ;;  %v727_v6 = vld [vmem:[%s912_s1 + $0xa] sm:$0x3] }
   0x3   :  { %v732_v7 = vld [vmem:[%s912_s1 + $0xc] sm:$0x3]  ;;  %v72_v8 = vrot.slane %v702_v1, 7  ;;  %v74_v9 = vrot.slane %v707_v2, 6  ;;  %v739_v10 = vld [vmem:[%s912_s1 + $0xe] sm:$0x3] }
   0x4   :  { %vm53_vm3 = vcmask 1044484   ;;  %v76_v11 = vrot.slane %v712_v3, 5  ;;  %v78_v12 = vrot.slane %v717_v4, 4  ;;  %vm56_vm4 = vcmask 1045509   ;;  %v749_v15 = vld [vmem:[%s913_s0 + $0x2] sm:$0x3] }
   0x5   :  { %vm59_vm5 = vcmask 1046534   ;;  %v73_v13 = vsel %vm44_vm0, %v72_v8, %v722_v5  ;;  %v80_v14 = vrot.slane %v727_v6, 3  ;;  %vm62_vm6 = vcmask 1047559   ;;  %v756_v18 = vld [vmem:[%s913_s0 + $0x4] sm:$0x3] }
   0x6   :  { %v75_v16 = vsel %vm47_vm1, %v74_v9, %v73_v13  ;;  %v82_v17 = vrot.slane %v732_v7, 2  ;;  %v761_v19 = vld [vmem:[%s913_s0 + $0x6] sm:$0x3]  ;;  %v84_v21 = vrot.slane %v739_v10, 1  ;;  %vm86_vm7 = vcmask 261120  }
   0x7   :  { %v77_v20 = vsel %vm50_vm2, %v76_v11, %v75_v16  ;;  %v19_v22 = vld [vmem:[%s913_s0] sm:$0x3]  ;;  %v771_v23 = vld [vmem:[%s913_s0 + $0x8] sm:$0x3]  ;;  %v777_v25 = vld [vmem:[%s913_s0 + $0xa] sm:$0x3] }
   0x8   :  { %v79_v24 = vsel %vm53_vm3, %v78_v12, %v77_v20  ;;  %v782_v26 = vld [vmem:[%s913_s0 + $0xc] sm:$0x3]  ;;  %v43_v27 = vrot.slane %v749_v15, 7  ;;  %vm665_vm8 = vmmov 0   ;;  %v791_v29 = vld [vmem:[%s913_s0 + $0xe] sm:$0x3] }
   0x9   :  { %v81_v28 = vsel %vm56_vm4, %v80_v14, %v79_v24  ;;  %595 = vmatprep.mubr.msk.f32.mxu0 %vm665_vm8, %v664_v0  ;;  %v46_v30 = vrot.slane %v756_v18, 6  ;;  %v49_v31 = vrot.slane %v761_v19, 5  ;;  %v52_v32 = vrot.slane %v771_v23, 4 }
   0xa   :  { %v83_v33 = vsel %vm59_vm5, %v82_v17, %v81_v28  ;;  %v45_v34 = vsel %vm44_vm0, %v43_v27, %v19_v22  ;;  %v55_v35 = vrot.slane %v777_v25, 3  ;;  %v58_v38 = vrot.slane %v782_v26, 2 }
   0xb   :  { %v85_v36 = vsel %vm62_vm6, %v84_v21, %v83_v33  ;;  %v48_v37 = vsel %vm47_vm1, %v46_v30, %v45_v34  ;;  %v61_v40 = vrot.slane %v791_v29, 1  ;;  %vm161_vm9 = vcmask 64512  }
   0xc   :  { %594 = vmatpush3.xpose.msk.msra.mxu0 %vm86_vm7, %v85_v36  ;;  %v51_v39 = vsel %vm50_vm2, %v49_v31, %v48_v37  ;;  %v262_v53 = vrot.slane %v722_v5, 1  ;;  %v264_v54 = vrot.slane %v707_v2, 7  ;;  %v266_v55 = vrot.slane %v712_v3, 6  ;;  %v454_v37 = vld [vmem:[%s915_s2 + $0x10] sm:$0xff] }
   0xd   :  { %v54_v41 = vsel %vm53_vm3, %v52_v32, %v51_v39  ;;  %598 = vmatprep.subr.mxu0 %v664_v0  ;;  %v268_v56 = vrot.slane %v717_v4, 5  ;;  %v248_v57 = vrot.slane %v19_v22, 1  ;;  %v270_v58 = vrot.slane %v727_v6, 4  ;;  %v455_v39 = vld [vmem:[%s915_s2 + $0x18] sm:$0xff] }
   0xe   :  { %v57_v42 = vsel %vm56_vm4, %v55_v35, %v54_v41  ;;  %v250_v59 = vrot.slane %v756_v18, 7  ;;  %v263_v60 = vsel %vm44_vm0, %v702_v1, %v262_v53  ;;  %v272_v61 = vrot.slane %v732_v7, 3  ;;  %v452_v35 = vld [vmem:[%s915_s2] sm:$0xff] }
   0xf   :  { %v60_v43 = vsel %vm59_vm5, %v58_v38, %v57_v42  ;;  %v252_v62 = vrot.slane %v761_v19, 6  ;;  %v265_v63 = vsel %vm47_vm1, %v264_v54, %v263_v60  ;;  %v274_v2 = vrot.slane %v739_v10, 2  ;;  %v456_v41 = vld [vmem:[%s915_s2 + $0x20] sm:$0xff]  ;;  %v457_v42 = vld [vmem:[%s915_s2 + $0x28] sm:$0xff] }
  0x10   :  { %v810_v44 = vsel %vm62_vm6, %v61_v40, %v60_v43  ;;  %v254_v3 = vrot.slane %v771_v23, 5  ;;  %v267_v4 = vsel %vm50_vm2, %v266_v55, %v265_v63  ;;  %v256_v5 = vrot.slane %v777_v25, 4 }
  0x11   :  { %596 = vmatmul.mubr.msk.f32.vlgmr.msra.gmra.mrb[0].mxu0 %vm86_vm7, %v810_v44  ;;  %v269_v6 = vsel %vm53_vm3, %v268_v56, %v267_v4  ;;  %v249_v8 = vsel %vm44_vm0, %v749_v15, %v248_v57  ;;  %v258_v1 = vrot.slane %v782_v26, 3  ;;  %v260_v11 = vrot.slane %v791_v29, 2 }
  0x12   :  { %599 = vmatpush3.msra.mxu0 %v85_v36  ;;  %600 = vmatprep.mubr.msk.f32.mxu0 %vm665_vm8, %v664_v0  ;;  %v271_v7 = vsel %vm56_vm4, %v270_v58, %v269_v6  ;;  %v251_v9 = vsel %vm47_vm1, %v250_v59, %v249_v8  ;;  %vm467_vm10 = vcmask 523264   ;;  %v453_v36 = vld [vmem:[%s915_s2 + $0x8] sm:$0xff]  ;;  %v636_v40 = vpack.c.bf16 %v455_v39, %v454_v37 }
  0x13   :  { %603 = vmatprep.subr.mxu0 %v664_v0  ;;  %v273_v10 = vsel %vm59_vm5, %v272_v61, %v271_v7  ;;  %v253_v12 = vsel %vm50_vm2, %v252_v62, %v251_v9  ;;  %v632_v38 = vpack.c.bf16 %v453_v36, %v452_v35  ;;  %v640_v43 = vpack.c.bf16 %v457_v42, %v456_v41 }
  0x14   :  { %v275_v13 = vsel %vm62_vm6, %v274_v2, %v273_v10  ;;  %v255_v14 = vsel %vm53_vm3, %v254_v3, %v253_v12  ;;  %vm438_vm11 = vcmask 130112   ;;  %vm556_vm12 = vcmask 523520  }
  0x15   :  { %v257_v16 = vsel %vm56_vm4, %v256_v5, %v255_v14  ;;  %633 = vmatprep.subr.bf16.mxu1 %v632_v38 }
  0x16   :  { %v259_v15 = vsel %vm59_vm5, %v258_v1, %v257_v16  ;;  %635 = vmatpush3.bf16.msra.mxu1 %v632_v38 }
  0x17   :  { %v848_v17 = vsel %vm62_vm6, %v260_v11, %v259_v15  ;;  %637 = vmatprep.subr.bf16.mxu1 %v636_v40 }
  0x1a   :  { %639 = vmatpush3.bf16.msra.mxu1 %v636_v40 }
  0x1b   :  { %641 = vmatprep.subr.bf16.mxu1 %v640_v43 }
  0x1e   :  { %643 = vmatpush3.bf16.msra.mxu1 %v640_v43 }
  0xe4   :  { %v157_v45 = vpop.f32.mrb[0].mxu0 }
  0xe5   :  { %v597_v46 = vpop.f32.mrb[1].mxu0  ;;  %v162_v47 = vsel %vm161_vm9, %v157_v45, -inf }
  0xe6   :  { %163 = vmax.xlane.f32.xlu0 %v162_v47 }
 0x173   :  { %v164_v48 = vpop.xlane.xlu0 %163 }
 0x174   :  { %v165_v49 = vsub.f32 %v157_v45, %v164_v48  ;;  %v459_v45 = vld [vmem:[%s915_s2 + $0x38] sm:$0xff] }
 0x176   :  { %v166_v50 = vmul.f32 1.442695, %v165_v49 }
 0x178   :  { %652 = vpow2.f32 %v166_v50 }
 0x182   :  { %v653_v51 = vpop.eup %652 }
 0x183   :  { %v168_v52 = vsel %vm161_vm9, %v653_v51, 0.0 }
 0x184   :  { %169 = vadd.xlane.f32.xlu0 %v168_v52  ;;  %v572_v52 = vld [vmem:[%s916_s3] ss:$0 sm:$0xff] }
 0x211   :  { %v170_v18 = vpop.xlane.xlu0 %169 }
 0x212   :  { %654 = vrcp.f32 %v170_v18 }
 0x21c   :  { %v655_v19 = vpop.eup %654 }
 0x21d   :  { %v172_v20 = vmul.f32 %v655_v19, %v653_v51 }
 0x21f   :  { %601 = vmatmul.mubr.msk.f32.vlgmr.msra.gmra.mrb[2].mxu0 %vm161_vm9, %v172_v20  ;;  %247 = vst.msk [vmem:[%s914_s5] sm:$0xff] %vm161_vm9, %v172_v20 }
 0x220   :  { %604 = vmatpush3.xpose.msk.msra.mxu0 %vm86_vm7, %v275_v13  ;;  %605 = vmatprep.mubr.msk.f32.mxu0 %vm665_vm8, %v664_v0 }
 0x221   :  { %608 = vmatprep.subr.mxu0 %v664_v0 }
 0x223   :  { %606 = vmatmul.mubr.msk.f32.vlgmr.msra.gmra.mrb[4].mxu0 %vm86_vm7, %v848_v17 }
 0x224   :  { %609 = vmatpush3.msra.mxu0 %v275_v13  ;;  %610 = vmatprep.mubr.msk.f32.mxu0 %vm665_vm8, %v664_v0 }
 0x2f2   :  { %v243_v21 = vpop.f32.mrb[2].mxu0 }
 0x2f3   :  { %444 = vrot.lane.b32.xlu0 %v243_v21, %s666_s25  ;;  %v602_v22 = vpop.f32.mrb[3].mxu0 }
 0x2f6   :  { %v346_v23 = vpop.f32.mrb[4].mxu0 }
 0x2f7   :  { %v607_v24 = vpop.f32.mrb[5].mxu0  ;;  %v350_v25 = vsel %vm161_vm9, %v346_v23, -inf }
 0x2f8   :  { %351 = vmax.xlane.f32.xlu1 %v350_v25 }
 0x365   :  { %v445_v26 = vpop.permute.xlu0 %444 }
 0x366   :  { %v450_v27 = vsel %vm86_vm7, %v810_v44, %v445_v26  ;;  %v458_v44 = vld [vmem:[%s915_s2 + $0x30] sm:$0xff] }
 0x367   :  { %629 = vmatprep.mubr.msk.f32.mxu1 %vm467_vm10, %v450_v27  ;;  %v644_v46 = vpack.c.bf16 %v459_v45, %v458_v44 }
 0x369   :  { %645 = vmatprep.subr.bf16.mxu1 %v644_v46 }
 0x36a   :  { %647 = vmatpush3.bf16.msra.mxu1 %v644_v46 }
 0x385   :  { %v352_v28 = vpop.xlane.xlu1 %351 }
 0x386   :  { %v353_v29 = vsub.f32 %v346_v23, %v352_v28 }
 0x388   :  { %v354_v0 = vmul.f32 1.442695, %v353_v29 }
 0x38a   :  { %656 = vpow2.f32 %v354_v0 }
 0x394   :  { %v657_v30 = vpop.eup %656 }
 0x395   :  { %v356_v31 = vsel %vm161_vm9, %v657_v30, 0.0 }
 0x396   :  { %357 = vadd.xlane.f32.xlu1 %v356_v31 }
 0x423   :  { %v358_v32 = vpop.xlane.xlu1 %357 }
 0x424   :  { %658 = vrcp.f32 %v358_v32 }
 0x42e   :  { %v659_v33 = vpop.eup %658 }
 0x42f   :  { %v360_v34 = vmul.f32 %v659_v33, %v657_v30 }
 0x431   :  { %611 = vmatmul.mubr.msk.f32.vlgmr.msra.gmra.mrb[6].mxu0 %vm161_vm9, %v360_v34 }
 0x504   :  { %v431_v47 = vpop.f32.mrb[6].mxu0 }
 0x505   :  { %446 = vrot.lane.b32.xlu1 %v431_v47, %s666_s25  ;;  %v612_v48 = vpop.f32.mrb[7].mxu0 }
 0x509   :  { %435 = vrot.lane.b32.xlu1 %v360_v34, %s667_s16 }
 0x577   :  { %v447_v49 = vpop.permute.xlu1 %446 }
 0x578   :  { %v451_v50 = vsel %vm86_vm7, %v848_v17, %v447_v49 }
 0x579   :  { %630 = vmatmul.mubr.msk.f32.vlgmr.msra.gmra.mrb[0].mxu1 %vm467_vm10, %v451_v50 }
 0x57b   :  { %v436_v51 = vpop.permute.xlu1 %435 }
 0x57c   :  { %439 = vst.msk [vmem:[%s914_s5] sm:$0xff] %vm438_vm11, %v436_v51 }
 0x64c   :  { %v631_v53 = vpop.f32.mrb[0].mxu1 }
 0x64d   :  { %v546_v54 = vadd.f32 %v631_v53, %v572_v52  ;;  %v540_v55 = vpop.f32.mrb[1].mxu1 }
 0x64e   :  { %v541_v56 = vadd.f32 %v572_v52, %v540_v55 }
 0x64f   :  { %660 = vtanh.f32 %v546_v54 }
 0x650   :  { %662 = vtanh.f32 %v541_v56 }
 0x659   :  { %v661_v57 = vpop.eup %660 }
 0x65a   :  { %v663_v58 = vpop.eup %662  ;;  %553 = vrot.lane.b32.xlu1 %v661_v57, %s666_s25 }
 0x65b   :  { %551 = vst.msk [vmem:[%s917_s4] sm:$0xff] %vm86_vm7, %v663_v58 }
 0x6cc   :  { %v554_v59 = vpop.permute.xlu1 %553 }
 0x6cd   :  { %557 = vst.msk [vmem:[%s917_s4] sm:$0xff] %vm556_vm12, %v554_v59 }

</bundles_post_ra>
